<compile_context>
chip_gen: v6e
topology: v6e:2x2x1
jax: 0.10.0
libtpu: 0.0.40
codegen_flags: <defaults>
</compile_context>

<pallas_src>
import functools

import numpy as np

import jax
import jax.numpy as jnp
from jax.experimental import pallas as pl
from jax.experimental.pallas import tpu as pltpu

LANE = 128


def _round_up(x, m):
    return ((x + m - 1) // m) * m


def _pick_tm(batch):
    """M-tile: >=128 (MXU depth), <=256 (v6e/v7x MXU tile), and small enough
    that the M grid has >=2 parallel steps whenever the batch allows (v7x
    dual-TensorCore sharding)."""
    tm = _round_up(max(1, -(-batch // 2)), LANE)
    return int(max(LANE, min(256, tm)))


def _const_spec(block_shape):
    """BlockSpec for a block whose index_map is constant (weight / bias).

    Single-buffer it when the jax version supports pipeline_mode: the block is
    fetched once, so double-buffering only doubles its VMEM footprint.
    """
    index_map = lambda i: (0, 0)
    try:
        return pl.BlockSpec(block_shape, index_map,
                            pipeline_mode=pl.Buffered(1))
    except (TypeError, AttributeError):
        return pl.BlockSpec(block_shape, index_map)


# ----------------------------------------------------------------------------
# Pallas kernel: one (tm, K) x (K, Np) tile -> bf16 matmul, f32 acc, + bias
# ----------------------------------------------------------------------------
def fc_kernel(x_ref, w_ref, b_ref, o_ref, *, compute_dtype):
    x = x_ref[...].astype(compute_dtype)          # VPU cast; MXU runs at bf16 peak
    acc = jnp.dot(x, w_ref[...], preferred_element_type=jnp.float32)
    o_ref[...] = (acc + b_ref[...]).astype(o_ref.dtype)


# ----------------------------------------------------------------------------
# Forward factory: pads / casts weights ONCE (prep time), returns jitted fwd
# ----------------------------------------------------------------------------
def make_nn_forward(w_fc1, b_fc1, *, compute_dtype=jnp.bfloat16):
    K, N = w_fc1.shape
    Np = _round_up(N, LANE)
    # One-time lane-dense padding; padded columns are zero and (if any) are
    # sliced off after the kernel. Weight is pre-cast to the compute dtype.
    w_pad = jnp.pad(w_fc1, ((0, 0), (0, Np - N))).astype(compute_dtype)
    b_pad = jnp.pad(b_fc1, (0, Np - N)).astype(jnp.float32).reshape(1, Np)
    c_itemsize = np.dtype(compute_dtype).itemsize

    @jax.jit
    def forward(x):
        B = x.shape[0]
        flat = x.reshape(B, -1)                    # nn.Flatten(start_dim=1)
        assert flat.shape[1] == K, (flat.shape, K)

        tm = _pick_tm(B)
        grid_m = pl.cdiv(B, tm)

        # Rough resident working set (bytes): double-buffered x / out tiles,
        # single-buffered weight + bias.
        x_bytes = 2 * tm * K * flat.dtype.itemsize
        w_bytes = K * Np * c_itemsize
        o_bytes = 2 * tm * Np * x.dtype.itemsize
        vmem_limit = int(min(40 << 20,
                             max(32 << 20, 2 * (x_bytes + w_bytes + o_bytes))))

        cost = pl.CostEstimate(
            flops=2 * grid_m * tm * K * Np,
            transcendentals=0,
            bytes_accessed=(B * K * flat.dtype.itemsize     # activations
                            + K * Np * c_itemsize           # weight
                            + Np * 4                        # bias
                            + B * Np * x.dtype.itemsize),   # output
        )

        out = pl.pallas_call(
            functools.partial(fc_kernel, compute_dtype=compute_dtype),
            out_shape=jax.ShapeDtypeStruct((B, Np), x.dtype),
            grid=(grid_m,),
            in_specs=[
                pl.BlockSpec((tm, K), lambda i: (i, 0)),   # activations (ragged last block OK)
                _const_spec((K, Np)),                      # weight, single-buffered
                _const_spec((1, Np)),                      # bias, single-buffered
            ],
            out_specs=pl.BlockSpec((tm, Np), lambda i: (i, 0)),
            compiler_params=pltpu.CompilerParams(
                dimension_semantics=("parallel",),
                vmem_limit_bytes=vmem_limit,
            ),
            cost_estimate=cost,
        )(flat, w_pad, b_pad)

        return out if Np == N else out[:, :N]

    return forward


# ----------------------------------------------------------------------------
# Pure-JAX references (sanity check)
# ----------------------------------------------------------------------------
def reference_forward_f32(x, w, b):
    return x.reshape(x.shape[0], -1) @ w + b


def reference_forward_bf16(x, w, b):
    flat = x.reshape(x.shape[0], -1)
    acc = jnp.dot(flat.astype(jnp.bfloat16), w.astype(jnp.bfloat16),
                  preferred_element_type=jnp.float32)
    return acc + b


# ----------------------------------------------------------------------------
if __name__ == "__main__":
    key = jax.random.PRNGKey(0)
    k_x, k_w, k_b = jax.random.split(key, 3)

    # Shapes consistent with the module: input_size = image_width*image_height
    image_height = image_width = 16
    hidden_neurons = 32
    B = 2

    x = jax.random.normal(
        k_x, (B, 1, image_height, image_width), dtype=jnp.float32
    )
    w_fc1 = (
        jax.random.normal(
            k_w, (image_height * image_width, hidden_neurons), dtype=jnp.float32
        )
        * 0.05
    )
    b_fc1 = jax.random.normal(k_b, (hidden_neurons,), dtype=jnp.float32) * 0.05

    forward = make_nn_forward(w_fc1, b_fc1)
    out = jax.block_until_ready(forward(x))
    assert out.shape == (B, hidden_neurons), out.shape
    assert out.dtype == jnp.float32, out.dtype

    ref_bf16 = jax.block_until_ready(
        jax.jit(reference_forward_bf16)(x, w_fc1, b_fc1))
    ref_f32 = jax.block_until_ready(
        jax.jit(reference_forward_f32)(x, w_fc1, b_fc1))

    err_bf16 = float(jnp.max(jnp.abs(out - ref_bf16)))   # same compute path
    err_f32 = float(jnp.max(jnp.abs(out - ref_f32)))     # full-f32 reference
    assert err_bf16 < 2e-3, f"mismatch vs bf16-matched reference: {err_bf16}"
    assert err_f32 < 3e-2, f"mismatch vs f32 reference: {err_f32}"

    print("KERNEL_OK")
</pallas_src>

<mosaic_0001>
module attributes {stable_mosaic.version = 11 : i64} {
  func.func @fc_kernel(%arg0: i32, %arg1: memref<128x256xf32, #tpu.memory_space<vmem>>, %arg2: memref<256x128xbf16, #tpu.memory_space<vmem>>, %arg3: memref<1x128xf32, #tpu.memory_space<vmem>>, %arg4: memref<128x128xf32, #tpu.memory_space<vmem>>) attributes {dimension_semantics = [#tpu.dimension_semantics<parallel>], iteration_bounds = array<i64: 1>, scalar_prefetch = 0 : i64, scratch_operands = 0 : i64, tpu.core_type = #tpu.core_type<tc>, window_params = [{transform_indices = @transform_0, window_bounds = array<i64: 128, 256>}, {pipeline_mode = #tpu.pipeline_mode<synchronous>, transform_indices = @transform_1, window_bounds = array<i64: 256, 128>}, {pipeline_mode = #tpu.pipeline_mode<synchronous>, transform_indices = @transform_2, window_bounds = array<i64: 1, 128>}, {transform_indices = @transform_3, window_bounds = array<i64: 128, 128>}]} {
    %c0 = arith.constant 0 : index
    %c0_0 = arith.constant 0 : index
    %0 = vector.load %arg1[%c0, %c0_0] : memref<128x256xf32, #tpu.memory_space<vmem>>, vector<128x256xf32>
    %1 = arith.truncf %0 : vector<128x256xf32> to vector<128x256xbf16>
    %c0_1 = arith.constant 0 : index
    %c0_2 = arith.constant 0 : index
    %2 = vector.load %arg2[%c0_1, %c0_2] : memref<256x128xbf16, #tpu.memory_space<vmem>>, vector<256x128xbf16>
    %cst = arith.constant dense<0.000000e+00> : vector<128x128xf32>
    %3 = tpu.matmul %1, %2, %cst {dimension_numbers = #tpu.dot_dimension_numbers<[1], [0], [0], [1], [0, 0, 1, 1], [], []>} : vector<128x256xbf16>, vector<256x128xbf16>, vector<128x128xf32> -> vector<128x128xf32>
    %c0_3 = arith.constant 0 : index
    %c0_4 = arith.constant 0 : index
    %4 = vector.load %arg3[%c0_3, %c0_4] : memref<1x128xf32, #tpu.memory_space<vmem>>, vector<1x128xf32>
    %5 = vector.broadcast %4 : vector<1x128xf32> to vector<128x128xf32>
    %6 = arith.addf %3, %5 : vector<128x128xf32>
    %c0_5 = arith.constant 0 : index
    %c0_6 = arith.constant 0 : index
    %7 = vector.load %arg4[%c0_5, %c0_6] : memref<128x128xf32, #tpu.memory_space<vmem>>, vector<128x128xf32>
    tpu.vector_store %arg4[%c0_5, %c0_6], %6 {strides = array<i32>} : memref<128x128xf32, #tpu.memory_space<vmem>>, vector<128x128xf32>,
    return
  }
  func.func @transform_0(%arg0: i32) -> (i32, i32) {
    %c0_i32 = arith.constant 0 : i32
    %c0_i32_0 = arith.constant 0 : i32
    return %arg0, %c0_i32 : i32, i32
  }
  func.func @transform_1(%arg0: i32) -> (i32, i32) {
    %c0_i32 = arith.constant 0 : i32
    %c0_i32_0 = arith.constant 0 : i32
    %c0_i32_1 = arith.constant 0 : i32
    return %c0_i32, %c0_i32_0 : i32, i32
  }
  func.func @transform_2(%arg0: i32) -> (i32, i32) {
    %c0_i32 = arith.constant 0 : i32
    %c0_i32_0 = arith.constant 0 : i32
    %c0_i32_1 = arith.constant 0 : i32
    return %c0_i32, %c0_i32_0 : i32, i32
  }
  func.func @transform_3(%arg0: i32) -> (i32, i32) {
    %c0_i32 = arith.constant 0 : i32
    %c0_i32_0 = arith.constant 0 : i32
    return %arg0, %c0_i32 : i32, i32
  }
}

</mosaic_0001>

<bundles_post_ra>
// kernel: forward.1
= control target key start
LH: loop header
LB: loop body
LE: loop exit
PB: predicated region body
PF: predicated region fallthrough
CT: control target
= control target key end

     0   :  { %8 = vsyncpa [#allocation3], 0  ;;  %s1136_s0 = inlined_call_operand.vmem [shape: f32[2,256], index: 0, kind: input, shape index: {}]   ;;  %s1137_s1 = inlined_call_operand.hbm [shape: bf16[256,128], index: 1, kind: input, shape index: {}]   ;;  %s1138_s2 = inlined_call_operand.vmem [shape: f32[1,128], index: 2, kind: input, shape index: {}]   ;;  %s1139_s3 = inlined_call_operand.hbm [shape: f32[2,128], index: 3, kind: output, shape index: {}]  }
   0x1   :  { %9 = vsyncpa [#allocation4], 0  ;;  %s987_s12 = smov [#allocation2]  }
   0x2   :  { %s17_s13 = sshll.u32 %s987_s12, 4  ;;  %s18_s13 = int_to_ptr.vmem [resolvable:$true] %s17_s13 }
   0x3   :  { %s951_s14 = scalar_lea.vmem %s18_s13, 2048  ;;  %p956_p1 = scmp.lt.s32.totalorder %s18_s13, %s18_s13 }
   0x4   :  { %p952_p0 = scmp.ne.s32.totalorder %s18_s13, %s951_s14  ;;  %p957_p2 = scmp.lt.s32.totalorder %s951_s14, %s951_s14 }
   0x6   :  { %p958_p3 = por %p957_p2, %p956_p1 }
   0x8   :  { %p959_p4 = pnand %p958_p3, %p952_p0 }
   0xa   :  { %962 = shalt.err (!%p959_p4)
}
   0xb   :  { %s988_s15 = smov 64   ;;  %s989_s16 = smov 4  }
   0xc   :  { %23 = dma.hbm_to_vmem [thread:$0]  %s1137_s1, 2048, %s18_s13, [#allocation3], %s988_s15, %s988_s15, %s989_s16  }
   0xd   :  { %983 = dma.done.wait [#allocation3], 2048  }
   0xe   :  { %984 = vsyncadd [#allocation3], 4294965248  ;;  %v863_v0 = vld [vmem:[#allocation2 + $0x78] sm:$0xff]   ;;  %v865_v2 = vld [vmem:[#allocation2 + $0x70] sm:$0xff]  }
   0xf   :  { %v864_v1 = vld [vmem:[#allocation2 + $0x38] sm:$0xff]   ;;  %776 = vmatprep.subr.bf16.mxu0 %v863_v0  ;;  %840 = vmatprep.subr.bf16.mxu1 %v863_v0  ;;  %v866_v3 = vld [vmem:[#allocation2 + $0x30] sm:$0xff]   ;;  %v867_v4 = vld [vmem:[#allocation2 + $0x68] sm:$0xff]  }
  0x10   :  { %777 = vmatpush3.bf16.msra.mxu0 %v864_v1  ;;  %848 = vmatpush3.bf16.msra.mxu1 %v864_v1  ;;  %v868_v5 = vld [vmem:[#allocation2 + $0x28] sm:$0xff]   ;;  %v869_v6 = vld [vmem:[#allocation2 + $0x60] sm:$0xff]   ;;  %v871_v8 = vld [vmem:[#allocation2 + $0x58] sm:$0xff]  }
  0x11   :  { %778 = vmatprep.subr.bf16.mxu0 %v865_v2  ;;  %841 = vmatprep.subr.bf16.mxu1 %v865_v2  ;;  %v870_v7 = vld [vmem:[#allocation2 + $0x20] sm:$0xff]   ;;  %v872_v9 = vld [vmem:[#allocation2 + $0x18] sm:$0xff]   ;;  %v873_v10 = vld [vmem:[#allocation2 + $0x50] sm:$0xff]  }
  0x12   :  { %v874_v11 = vld [vmem:[#allocation2 + $0x10] sm:$0xff]   ;;  %v875_v12 = vld [vmem:[#allocation2 + $0x48] sm:$0xff]   ;;  %v911_v13 = vld.sshfl [vmem:[%s1136_s0] sm:$0xff pattern:$0x76325410] }
  0x13   :  { %v912_v14 = vld.sshfl [vmem:[%s1136_s0 + $0x8] sm:$0xff pattern:$0x76325410]  ;;  %v913_v15 = vld.sshfl [vmem:[%s1136_s0 + $0x10] sm:$0xff pattern:$0x76325410] }
  0x14   :  { %779 = vmatpush3.bf16.msra.mxu0 %v866_v3  ;;  %849 = vmatpush3.bf16.msra.mxu1 %v866_v3  ;;  %v914_v16 = vld.sshfl [vmem:[%s1136_s0 + $0x18] sm:$0xff pattern:$0x76325410]  ;;  %v876_v17 = vld [vmem:[#allocation2 + $0x8] sm:$0xff]   ;;  %v877_v18 = vld [vmem:[#allocation2 + $0x40] sm:$0xff]   ;;  %v175_v20 = vcombine.high %v911_v13, %v912_v14  ;;  %v174_v27 = vcombine.low %v911_v13, %v912_v14 }
  0x15   :  { %780 = vmatprep.subr.bf16.mxu0 %v867_v4  ;;  %842 = vmatprep.subr.bf16.mxu1 %v867_v4  ;;  %v915_v19 = vld.sshfl [vmem:[%s1136_s0 + $0x80] sm:$0xff pattern:$0x76325410]  ;;  %v193_v21 = vcombine.high %v913_v15, %v914_v16  ;;  %v916_v22 = vld.sshfl [vmem:[%s1136_s0 + $0x88] sm:$0xff pattern:$0x76325410]  ;;  %v192_v28 = vcombine.low %v913_v15, %v914_v16 }
  0x16   :  { %v917_v23 = vld.sshfl [vmem:[%s1136_s0 + $0x90] sm:$0xff pattern:$0x76325410]  ;;  %v918_v24 = vld.sshfl [vmem:[%s1136_s0 + $0x98] sm:$0xff pattern:$0x76325410]  ;;  %v319_v30 = vcombine.high %v915_v19, %v916_v22  ;;  %v318_v32 = vcombine.low %v915_v19, %v916_v22 }
  0x17   :  { %v878_v25 = vld [vmem:[#allocation2] sm:$0xff]   ;;  %v479_v26 = vpack.c.bf16 %v193_v21, %v175_v20  ;;  %v337_v31 = vcombine.high %v917_v23, %v918_v24  ;;  %v920_v33 = vld.sshfl [vmem:[%s1136_s0 + $0x28] sm:$0xff pattern:$0x76325410]  ;;  %v336_v36 = vcombine.low %v917_v23, %v918_v24  ;;  %v478_v38 = vpack.c.bf16 %v192_v28, %v174_v27 }
  0x18   :  { %781 = vmatpush3.bf16.msra.mxu0 %v868_v5  ;;  %850 = vmatpush3.bf16.msra.mxu1 %v868_v5  ;;  %v919_v29 = vld.sshfl [vmem:[%s1136_s0 + $0x20] sm:$0xff pattern:$0x76325410]  ;;  %v921_v34 = vld.sshfl [vmem:[%s1136_s0 + $0x30] sm:$0xff pattern:$0x76325410] }
  0x19   :  { %782 = vmatprep.subr.bf16.mxu0 %v869_v6  ;;  %843 = vmatprep.subr.bf16.mxu1 %v869_v6  ;;  %v922_v35 = vld.sshfl [vmem:[%s1136_s0 + $0x38] sm:$0xff pattern:$0x76325410]  ;;  %v487_v37 = vpack.c.bf16 %v337_v31, %v319_v30  ;;  %v486_v39 = vpack.c.bf16 %v336_v36, %v318_v32  ;;  %v923_v40 = vld.sshfl [vmem:[%s1136_s0 + $0xa0] sm:$0xff pattern:$0x76325410]  ;;  %v211_v41 = vcombine.high %v919_v29, %v920_v33 }
  0x1a   :  { %661 = vmatprep.mubr.bf16.mxu0 %v479_v26  ;;  %v229_v42 = vcombine.high %v921_v34, %v922_v35  ;;  %v924_v43 = vld.sshfl [vmem:[%s1136_s0 + $0xa8] sm:$0xff pattern:$0x76325410]  ;;  %v925_v44 = vld.sshfl [vmem:[%s1136_s0 + $0xb0] sm:$0xff pattern:$0x76325410]  ;;  %v210_v47 = vcombine.low %v919_v29, %v920_v33  ;;  %v228_v48 = vcombine.low %v921_v34, %v922_v35 }
  0x1b   :  { %v926_v45 = vld.sshfl [vmem:[%s1136_s0 + $0xb8] sm:$0xff pattern:$0x76325410]  ;;  %693 = vmatprep.mubr.bf16.mxu1 %v487_v37  ;;  %v927_v49 = vld.sshfl [vmem:[%s1136_s0 + $0x40] sm:$0xff pattern:$0x76325410]  ;;  %v355_v50 = vcombine.high %v923_v40, %v924_v43  ;;  %v354_v52 = vcombine.low %v923_v40, %v924_v43 }
  0x1c   :  { %783 = vmatpush3.bf16.msra.mxu0 %v870_v7  ;;  %851 = vmatpush3.bf16.msra.mxu1 %v870_v7  ;;  %v481_v46 = vpack.c.bf16 %v229_v42, %v211_v41  ;;  %v373_v51 = vcombine.high %v925_v44, %v926_v45  ;;  %v372_v53 = vcombine.low %v925_v44, %v926_v45  ;;  %v928_v54 = vld.sshfl [vmem:[%s1136_s0 + $0x48] sm:$0xff pattern:$0x76325410]  ;;  %v929_v55 = vld.sshfl [vmem:[%s1136_s0 + $0x50] sm:$0xff pattern:$0x76325410] }
  0x1d   :  { %784 = vmatprep.subr.bf16.mxu0 %v871_v8  ;;  %844 = vmatprep.subr.bf16.mxu1 %v871_v8  ;;  %v930_v56 = vld.sshfl [vmem:[%s1136_s0 + $0x58] sm:$0xff pattern:$0x76325410]  ;;  %v480_v58 = vpack.c.bf16 %v228_v48, %v210_v47  ;;  %v931_v60 = vld.sshfl [vmem:[%s1136_s0 + $0xc0] sm:$0xff pattern:$0x76325410]  ;;  %v247_v61 = vcombine.high %v927_v49, %v928_v54  ;;  %v246_v3 = vcombine.low %v927_v49, %v928_v54 }
  0x1e   :  { %v489_v57 = vpack.c.bf16 %v373_v51, %v355_v50  ;;  %v488_v59 = vpack.c.bf16 %v372_v53, %v354_v52  ;;  %v932_v62 = vld.sshfl [vmem:[%s1136_s0 + $0xc8] sm:$0xff pattern:$0x76325410]  ;;  %v933_v63 = vld.sshfl [vmem:[%s1136_s0 + $0xd0] sm:$0xff pattern:$0x76325410]  ;;  %v265_v1 = vcombine.high %v929_v55, %v930_v56  ;;  %v264_v4 = vcombine.low %v929_v55, %v930_v56 }
  0x1f   :  { %v934_v0 = vld.sshfl [vmem:[%s1136_s0 + $0xd8] sm:$0xff pattern:$0x76325410]  ;;  %v935_v5 = vld.sshfl [vmem:[%s1136_s0 + $0x60] sm:$0xff pattern:$0x76325410]  ;;  %v391_v6 = vcombine.high %v931_v60, %v932_v62  ;;  %v390_v8 = vcombine.low %v931_v60, %v932_v62 }
  0x20   :  { %785 = vmatpush3.bf16.msra.mxu0 %v872_v9  ;;  %852 = vmatpush3.bf16.msra.mxu1 %v872_v9  ;;  %v483_v2 = vpack.c.bf16 %v265_v1, %v247_v61  ;;  %v409_v7 = vcombine.high %v933_v63, %v934_v0  ;;  %v408_v9 = vcombine.low %v933_v63, %v934_v0  ;;  %v939_v16 = vld.sshfl [vmem:[%s1136_s0 + $0xe0] sm:$0xff pattern:$0x76325410]  ;;  %v941_v19 = vld.sshfl [vmem:[%s1136_s0 + $0xf0] sm:$0xff pattern:$0x76325410] }
  0x21   :  { %786 = vmatprep.subr.bf16.mxu0 %v873_v10  ;;  %845 = vmatprep.subr.bf16.mxu1 %v873_v10  ;;  %v936_v10 = vld.sshfl [vmem:[%s1136_s0 + $0x68] sm:$0xff pattern:$0x76325410]  ;;  %v482_v14 = vpack.c.bf16 %v264_v4, %v246_v3  ;;  %v942_v20 = vld.sshfl [vmem:[%s1136_s0 + $0xf8] sm:$0xff pattern:$0x76325410] }
  0x22   :  { %v491_v13 = vpack.c.bf16 %v409_v7, %v391_v6  ;;  %v490_v15 = vpack.c.bf16 %v408_v9, %v390_v8  ;;  %v282_v23 = vcombine.low %v935_v5, %v936_v10  ;;  %v445_v26 = vcombine.high %v941_v19, %v942_v20  ;;  %v1115_v34 = vld [vmem:[%s1138_s2] ss:$0 sm:$0xff] }
  0x23   :  { %v444_v28 = vcombine.low %v941_v19, %v942_v20 }
  0x24   :  { %787 = vmatpush3.bf16.msra.mxu0 %v874_v11  ;;  %853 = vmatpush3.bf16.msra.mxu1 %v874_v11  ;;  %v937_v11 = vld.sshfl [vmem:[%s1136_s0 + $0x70] sm:$0xff pattern:$0x76325410] }
  0x25   :  { %788 = vmatprep.subr.bf16.mxu0 %v875_v12  ;;  %846 = vmatprep.subr.bf16.mxu1 %v875_v12  ;;  %v938_v12 = vld.sshfl [vmem:[%s1136_s0 + $0x78] sm:$0xff pattern:$0x76325410] }
  0x26   :  { %v301_v21 = vcombine.high %v937_v11, %v938_v12  ;;  %v300_v24 = vcombine.low %v937_v11, %v938_v12 }
  0x28   :  { %789 = vmatpush3.bf16.msra.mxu0 %v876_v17  ;;  %854 = vmatpush3.bf16.msra.mxu1 %v876_v17  ;;  %v283_v17 = vcombine.high %v935_v5, %v936_v10  ;;  %v484_v30 = vpack.c.bf16 %v300_v24, %v282_v23 }
  0x29   :  { %790 = vmatprep.subr.bf16.mxu0 %v877_v18  ;;  %847 = vmatprep.subr.bf16.mxu1 %v877_v18  ;;  %v940_v18 = vld.sshfl [vmem:[%s1136_s0 + $0xe8] sm:$0xff pattern:$0x76325410] }
  0x2a   :  { %v485_v22 = vpack.c.bf16 %v301_v21, %v283_v17  ;;  %v426_v27 = vcombine.low %v939_v16, %v940_v18 }
  0x2c   :  { %791 = vmatpush3.bf16.msra.mxu0 %v878_v25  ;;  %855 = vmatpush3.bf16.msra.mxu1 %v878_v25  ;;  %v427_v25 = vcombine.high %v939_v16, %v940_v18  ;;  %v492_v31 = vpack.c.bf16 %v444_v28, %v426_v27 }
  0x2e   :  { %v493_v29 = vpack.c.bf16 %v445_v26, %v427_v25 }
  0x2f   :  { %662 = vmatmul.mubr.bf16.vlgmr.msra.gmra.mxu0 %v478_v38  ;;  %694 = vmatmul.mubr.bf16.vlgmr.msra.gmra.mxu1 %v486_v39 }
  0x30   :  { %669 = vmatprep.mubr.bf16.mxu0 %v481_v46  ;;  %701 = vmatprep.mubr.bf16.mxu1 %v489_v57 }
  0x37   :  { %670 = vmatmul.mubr.bf16.gmra.mxu0 %v480_v58  ;;  %702 = vmatmul.mubr.bf16.gmra.mxu1 %v488_v59 }
  0x38   :  { %677 = vmatprep.mubr.bf16.mxu0 %v483_v2  ;;  %709 = vmatprep.mubr.bf16.mxu1 %v491_v13 }
  0x3f   :  { %678 = vmatmul.mubr.bf16.gmra.mxu0 %v482_v14  ;;  %710 = vmatmul.mubr.bf16.gmra.mxu1 %v490_v15 }
  0x40   :  { %685 = vmatprep.mubr.bf16.mxu0 %v485_v22  ;;  %717 = vmatprep.mubr.bf16.mxu1 %v493_v29 }
  0x47   :  { %686 = vmatmul.mubr.bf16.gmra.mxu0 %v484_v30  ;;  %718 = vmatmul.mubr.bf16.gmra.mxu1 %v492_v31 }
  0xef   :  { %v792_v32 = vpop.f32.mrf.mxu0  ;;  %v816_v33 = vpop.f32.mrf.mxu1 }
  0xf1   :  { %v793_v35 = vpop.f32.mrf.mxu0  ;;  %v817_v36 = vpop.f32.mrf.mxu1 }
  0xf2   :  { %v794_v37 = vadd.f32 %v793_v35, %v792_v32  ;;  %v818_v38 = vadd.f32 %v817_v36, %v816_v33 }
  0xf3   :  { %v795_v39 = vpop.f32.mrf.mxu0  ;;  %v819_v40 = vpop.f32.mrf.mxu1 }
  0xf4   :  { %v664_v41 = vadd.f32 %v794_v37, %v1115_v34  ;;  %v696_v42 = vadd.f32 %v818_v38, %v1115_v34 }
  0xf5   :  { %v796_v43 = vpop.f32.mrf.mxu0  ;;  %v820_v44 = vpop.f32.mrf.mxu1 }
  0xf6   :  { %726 = vst [vmem:[#allocation5] sm:$0xff] %v664_v41  ;;  %734 = vst [vmem:[#allocation5 + $0x40] sm:$0xff] %v696_v42  ;;  %v797_v45 = vadd.f32 %v796_v43, %v795_v39  ;;  %v821_v46 = vadd.f32 %v820_v44, %v819_v40 }
  0xf7   :  { %v798_v47 = vpop.f32.mrf.mxu0  ;;  %v822_v48 = vpop.f32.mrf.mxu1 }
  0xf8   :  { %v667_v49 = vadd.f32 %v797_v45, %v1115_v34  ;;  %v699_v50 = vadd.f32 %v821_v46, %v1115_v34 }
  0xf9   :  { %v799_v51 = vpop.f32.mrf.mxu0  ;;  %v823_v52 = vpop.f32.mrf.mxu1 }
  0xfa   :  { %727 = vst [vmem:[#allocation5 + $0x8] sm:$0xff] %v667_v49  ;;  %735 = vst [vmem:[#allocation5 + $0x48] sm:$0xff] %v699_v50  ;;  %v800_v53 = vadd.f32 %v799_v51, %v798_v47  ;;  %v824_v54 = vadd.f32 %v823_v52, %v822_v48 }
  0xfb   :  { %v801_v55 = vpop.f32.mrf.mxu0  ;;  %v825_v56 = vpop.f32.mrf.mxu1 }
  0xfc   :  { %v672_v57 = vadd.f32 %v800_v53, %v1115_v34  ;;  %v704_v58 = vadd.f32 %v824_v54, %v1115_v34 }
  0xfd   :  { %v802_v59 = vpop.f32.mrf.mxu0  ;;  %v826_v60 = vpop.f32.mrf.mxu1 }
  0xfe   :  { %728 = vst [vmem:[#allocation5 + $0x10] sm:$0xff] %v672_v57  ;;  %736 = vst [vmem:[#allocation5 + $0x50] sm:$0xff] %v704_v58  ;;  %v803_v61 = vadd.f32 %v802_v59, %v801_v55  ;;  %v827_v62 = vadd.f32 %v826_v60, %v825_v56 }
  0xff   :  { %v804_v63 = vpop.f32.mrf.mxu0  ;;  %v828_v0 = vpop.f32.mrf.mxu1 }
 0x100   :  { %v675_v1 = vadd.f32 %v803_v61, %v1115_v34  ;;  %v707_v2 = vadd.f32 %v827_v62, %v1115_v34 }
 0x101   :  { %v805_v3 = vpop.f32.mrf.mxu0  ;;  %v829_v4 = vpop.f32.mrf.mxu1 }
 0x102   :  { %729 = vst [vmem:[#allocation5 + $0x18] sm:$0xff] %v675_v1  ;;  %737 = vst [vmem:[#allocation5 + $0x58] sm:$0xff] %v707_v2  ;;  %v806_v5 = vadd.f32 %v805_v3, %v804_v63  ;;  %v830_v6 = vadd.f32 %v829_v4, %v828_v0 }
 0x103   :  { %v807_v7 = vpop.f32.mrf.mxu0  ;;  %v831_v8 = vpop.f32.mrf.mxu1 }
 0x104   :  { %v680_v9 = vadd.f32 %v806_v5, %v1115_v34  ;;  %v712_v10 = vadd.f32 %v830_v6, %v1115_v34 }
 0x105   :  { %v808_v11 = vpop.f32.mrf.mxu0  ;;  %v832_v12 = vpop.f32.mrf.mxu1 }
 0x106   :  { %730 = vst [vmem:[#allocation5 + $0x20] sm:$0xff] %v680_v9  ;;  %738 = vst [vmem:[#allocation5 + $0x60] sm:$0xff] %v712_v10  ;;  %v809_v13 = vadd.f32 %v808_v11, %v807_v7  ;;  %v833_v14 = vadd.f32 %v832_v12, %v831_v8 }
 0x107   :  { %v810_v15 = vpop.f32.mrf.mxu0  ;;  %v834_v16 = vpop.f32.mrf.mxu1 }
 0x108   :  { %v683_v17 = vadd.f32 %v809_v13, %v1115_v34  ;;  %v715_v18 = vadd.f32 %v833_v14, %v1115_v34 }
 0x109   :  { %v811_v19 = vpop.f32.mrf.mxu0  ;;  %v835_v20 = vpop.f32.mrf.mxu1 }
 0x10a   :  { %731 = vst [vmem:[#allocation5 + $0x28] sm:$0xff] %v683_v17  ;;  %739 = vst [vmem:[#allocation5 + $0x68] sm:$0xff] %v715_v18  ;;  %v812_v21 = vadd.f32 %v811_v19, %v810_v15  ;;  %v836_v22 = vadd.f32 %v835_v20, %v834_v16 }
 0x10b   :  { %v813_v23 = vpop.f32.mrf.mxu0  ;;  %v837_v24 = vpop.f32.mrf.mxu1 }
 0x10c   :  { %v688_v25 = vadd.f32 %v812_v21, %v1115_v34  ;;  %v720_v26 = vadd.f32 %v836_v22, %v1115_v34 }
 0x10d   :  { %v814_v27 = vpop.f32.mrf.mxu0  ;;  %v838_v28 = vpop.f32.mrf.mxu1 }
 0x10e   :  { %732 = vst [vmem:[#allocation5 + $0x30] sm:$0xff] %v688_v25  ;;  %740 = vst [vmem:[#allocation5 + $0x70] sm:$0xff] %v720_v26  ;;  %v815_v29 = vadd.f32 %v814_v27, %v813_v23  ;;  %v839_v30 = vadd.f32 %v838_v28, %v837_v24 }
 0x110   :  { %v691_v31 = vadd.f32 %v815_v29, %v1115_v34  ;;  %v723_v32 = vadd.f32 %v839_v30, %v1115_v34 }
 0x112   :  { %733 = vst [vmem:[#allocation5 + $0x38] sm:$0xff] %v691_v31  ;;  %741 = vst [vmem:[#allocation5 + $0x78] sm:$0xff] %v723_v32 }
 0x113   :  { %746 = vsyncadd [#allocation4], 2016  ;;  %s990_s2 = smov [#allocation5]  }
 0x114   :  { %s747_s27 = sshll.u32 %s990_s2, 4  ;;  %s748_s27 = int_to_ptr.vmem [resolvable:$true] %s747_s27 }
 0x115   :  { %s963_s28 = scalar_lea.vmem %s748_s27, 32  ;;  %s967_s29 = scalar_lea.vmem %s748_s27, 2048 }
 0x116   :  { %p964_p5 = scmp.ne.s32.totalorder %s748_s27, %s963_s28  ;;  %p968_p6 = scmp.lt.s32.totalorder %s748_s27, %s748_s27 }
 0x117   :  { %p969_p7 = scmp.lt.s32.totalorder %s967_s29, %s963_s28 }
 0x119   :  { %p970_p8 = por %p969_p7, %p968_p6 }
 0x11b   :  { %p971_p9 = pnand %p970_p8, %p964_p5 }
 0x11d   :  { %974 = shalt.err (!%p971_p9)
}
 0x11e   :  { %s991_s30 = smov 32   ;;  %s992_s4 = smov 2  }
 0x11f   :  { %753 = dma.vmem_to_hbm [thread:$0]  %s748_s27, 32, %s1139_s3, [#allocation4], %s991_s30, %s991_s30, %s992_s4  }
 0x120   :  { %985 = dma.done.wait [#allocation4], 2048  }
 0x121   :  { %986 = vsyncadd [#allocation4], 4294965248 }
 0x122   :  { %757 = vsyncpa [#allocation3], 1 }
 0x123   :  { %758 = vsyncpa [#allocation4], 1 }

</bundles_post_ra>
